<compile_context>
chip_gen: v5e
topology: v5e:2x2
jax: 0.10.0
libtpu: 0.0.40
codegen_flags: <defaults>
</compile_context>

<pallas_src>
import numpy as np
import jax
import jax.numpy as jnp
from jax.experimental import pallas as pl
from jax.experimental.pallas import tpu as pltpu

_LANE = 128
_SUBLANE = 8


# ----------------------------------------------------------------------------
# Kernel: one grid step handles TB batch elements.
#   x_ref   : [K, TB]  packed params (K = G * n_max, padded to a multiple of 8)
#   aux_ref : [K, 4]   per-row constants: (lb, ub, w_upper, w_lower)
#   out_ref : [1, TB]  per-batch-element loss (lane-dense store)
# ----------------------------------------------------------------------------
def _range_bound_loss_kernel(x_ref, aux_ref, out_ref):
    x = x_ref[...]                                   # [K, TB] f32
    lb = aux_ref[:, 0:1]                             # [K, 1]
    ub = aux_ref[:, 1:2]
    wu = aux_ref[:, 2:3]                             # factor       (or 0 on pads)
    wl = aux_ref[:, 3:4]                             # factor/count (or 0 on pads)
    contrib = wu * jnp.maximum(x - ub, 0.0) + wl * jnp.maximum(lb - x, 0.0)
    out_ref[...] = jnp.sum(contrib, axis=0, keepdims=True)   # [1, TB]


# ----------------------------------------------------------------------------
# Static (host-side numpy) packing of the per-row constants.  Only touches
# bounds / factor / group SIZES — never parameter values — so it is safe to
# run at trace time.
# ----------------------------------------------------------------------------
def _pack_constants(lb, ub, counts, factor):
    lb = np.asarray(lb, np.float32).reshape(-1)
    ub = np.asarray(ub, np.float32).reshape(-1)
    counts = [int(c) for c in counts]
    g = len(counts)
    if lb.shape[0] != g or ub.shape[0] != g:
        raise ValueError("lb/ub must have one entry per parameter group")
    n_max = max(counts)
    k = g * n_max
    k_pad = max(_SUBLANE, -(-k // _SUBLANE) * _SUBLANE)

    aux = np.zeros((k_pad, 4), np.float32)           # pad rows: zero weights
    f = float(factor)
    for i in range(g):
        r0, c = i * n_max, counts[i]
        aux[r0:r0 + c, 0] = lb[i]
        aux[r0:r0 + c, 1] = ub[i]
        aux[r0:r0 + c, 2] = f                        # upper term: sum
        aux[r0:r0 + c, 3] = f / c                    # lower term: mean
    return jnp.asarray(aux), n_max, k_pad


# jnp-only parameter packing: works on traced arrays under jit.
def _pack_params(groups, counts, n_max, k_pad):
    cols = []
    for p, c in zip(groups, counts):
        if c < n_max:
            p = jnp.pad(p, ((0, 0), (0, n_max - c)))  # pad positions have 0 weight
        cols.append(p)
    x = jnp.concatenate(cols, axis=1)                 # (B, G * n_max)
    if x.shape[1] < k_pad:
        x = jnp.pad(x, ((0, 0), (0, k_pad - x.shape[1])))
    return x.T                                        # (k_pad, B): batch on lanes


# ----------------------------------------------------------------------------
# Batched API: params is a list of G arrays; group i has shape (B, n_i)
# (the last group may be (B,) or (B, 1), i.e. a per-example scalar).
# Returns (B,) f32 losses.  lb / ub / factor are static.
# ----------------------------------------------------------------------------
def range_bound_loss_batched(params, lb, ub, factor=1.0, batch_tile=128):
    if batch_tile % _LANE != 0:
        raise ValueError("batch_tile must be a multiple of 128")

    groups = [jnp.asarray(p, jnp.float32) for p in params]
    groups = [p[:, None] if p.ndim == 1 else p for p in groups]
    b = groups[0].shape[0]
    if any(p.shape[0] != b for p in groups):
        raise ValueError("all parameter groups must share the same batch size")
    counts = [int(p.shape[1]) for p in groups]

    aux, n_max, k_pad = _pack_constants(lb, ub, counts, factor)
    x = _pack_params(groups, counts, n_max, k_pad)    # (k_pad, B)

    b_pad = -(-b // batch_tile) * batch_tile
    if b_pad != b:
        # Padded batch columns produce garbage losses that are sliced off below.
        x = jnp.pad(x, ((0, 0), (0, b_pad - b)))

    out = pl.pallas_call(
        _range_bound_loss_kernel,
        out_shape=jax.ShapeDtypeStruct((1, b_pad), jnp.float32),
        grid=(b_pad // batch_tile,),
        in_specs=[
            pl.BlockSpec((k_pad, batch_tile), lambda i: (0, i)),
            pl.BlockSpec((k_pad, 4), lambda i: (0, 0)),
        ],
        out_specs=pl.BlockSpec((1, batch_tile), lambda i: (0, i)),
        compiler_params=pltpu.CompilerParams(
            dimension_semantics=("parallel",)),
    )(x, aux)
    return out[0, :b]


# ----------------------------------------------------------------------------
# Single-evaluation API mirroring RangeBoundLoss.forward exactly: params is a
# list of 1-D parameter groups, the final entry a scalar.  Returns a scalar.
# ----------------------------------------------------------------------------
def range_bound_loss(params, lb, ub, factor=1.0):
    groups = [jnp.asarray(p, jnp.float32).reshape(1, -1) for p in params]
    return range_bound_loss_batched(groups, lb, ub, factor)[0]


# ----------------------------------------------------------------------------
# Demo / correctness check
# ----------------------------------------------------------------------------
def _reference_batched(groups_np, lb, ub, factor):
    """Pure-numpy (f64) reference mirroring the PyTorch forward, per batch row."""
    b = groups_np[0].shape[0]
    loss = np.zeros((b,), np.float64)
    for i in range(len(groups_np) - 1):
        p = groups_np[i].astype(np.float64)
        loss += np.sum(factor * np.maximum(p - ub[i], 0.0), axis=1)
        loss += np.mean(factor * np.maximum(lb[i] - p, 0.0), axis=1)
    p_last = groups_np[-1].astype(np.float64).reshape(b)
    loss += factor * np.maximum(p_last - ub[-1], 0.0)
    loss += factor * np.maximum(lb[-1] - p_last, 0.0)
    return loss


if __name__ == "__main__":
    lb = [0.0, 0.1, 0.2]
    ub = [1.0, 0.9, 0.8]
    factor = 1.5

    key = jax.random.PRNGKey(0)
    k0, k1, k2 = jax.random.split(key, 3)
    B = 256                                           # 2 grid steps of 128
    # Two vector parameter groups (len 8) + a scalar group, per batch element,
    # with values deliberately out of range so both relu terms are exercised.
    g0 = jax.random.uniform(k0, (B, 8), jnp.float32, minval=-0.5, maxval=1.5)
    g1 = jax.random.uniform(k1, (B, 8), jnp.float32, minval=-0.5, maxval=1.5)
    g2 = jax.random.uniform(k2, (B,), jnp.float32, minval=-0.5, maxval=1.5)

    # Batched evaluation (the throughput path).
    losses = jax.block_until_ready(
        range_bound_loss_batched([g0, g1, g2], lb, ub, factor, batch_tile=128))

    ref = _reference_batched(
        [np.asarray(g0), np.asarray(g1), np.asarray(g2)], lb, ub, factor)
    np.testing.assert_allclose(np.asarray(losses, np.float64), ref,
                               rtol=1e-5, atol=1e-6)

    # Single-evaluation path matching the PyTorch module's forward signature.
    single = jax.block_until_ready(
        range_bound_loss([g0[0], g1[0], g2[0]], lb, ub, factor))
    np.testing.assert_allclose(float(single), ref[0], rtol=1e-5, atol=1e-6)

    print("KERNEL_OK")
</pallas_src>

<mosaic_0001>
module attributes {stable_mosaic.version = 11 : i64} {
  func.func @_range_bound_loss_kernel(%arg0: i32, %arg1: memref<24x128xf32, #tpu.memory_space<vmem>>, %arg2: memref<24x4xf32, #tpu.memory_space<vmem>>, %arg3: memref<1x128xf32, #tpu.memory_space<vmem>>) attributes {dimension_semantics = [#tpu.dimension_semantics<parallel>], iteration_bounds = array<i64: 2>, scalar_prefetch = 0 : i64, scratch_operands = 0 : i64, tpu.core_type = #tpu.core_type<tc>, window_params = [{transform_indices = @transform_0, window_bounds = array<i64: 24, 128>}, {pipeline_mode = #tpu.pipeline_mode<synchronous>, transform_indices = @transform_1, window_bounds = array<i64: 24, 4>}, {transform_indices = @transform_2, window_bounds = array<i64: 1, 128>}]} {
    %c0 = arith.constant 0 : index
    %c0_0 = arith.constant 0 : index
    %0 = vector.load %arg1[%c0, %c0_0] : memref<24x128xf32, #tpu.memory_space<vmem>>, vector<24x128xf32>
    %c0_1 = arith.constant 0 : index
    %c0_2 = arith.constant 0 : index
    %1 = vector.load %arg2[%c0_1, %c0_2] : memref<24x4xf32, #tpu.memory_space<vmem>>, vector<24x1xf32>
    %c0_3 = arith.constant 0 : index
    %c1 = arith.constant 1 : index
    %2 = vector.load %arg2[%c0_3, %c1] : memref<24x4xf32, #tpu.memory_space<vmem>>, vector<24x1xf32>
    %c0_4 = arith.constant 0 : index
    %c2 = arith.constant 2 : index
    %3 = vector.load %arg2[%c0_4, %c2] : memref<24x4xf32, #tpu.memory_space<vmem>>, vector<24x1xf32>
    %c0_5 = arith.constant 0 : index
    %c3 = arith.constant 3 : index
    %4 = vector.load %arg2[%c0_5, %c3] : memref<24x4xf32, #tpu.memory_space<vmem>>, vector<24x1xf32>
    %5 = vector.broadcast %2 : vector<24x1xf32> to vector<24x128xf32>
    %6 = arith.subf %0, %5 : vector<24x128xf32>
    %cst = arith.constant 0.000000e+00 : f32
    %7 = vector.broadcast %cst : f32 to vector<24x128xf32>
    %8 = arith.maximumf %6, %7 : vector<24x128xf32>
    %9 = vector.broadcast %3 : vector<24x1xf32> to vector<24x128xf32>
    %10 = arith.mulf %9, %8 : vector<24x128xf32>
    %11 = vector.broadcast %1 : vector<24x1xf32> to vector<24x128xf32>
    %12 = arith.subf %11, %0 : vector<24x128xf32>
    %cst_6 = arith.constant 0.000000e+00 : f32
    %13 = vector.broadcast %cst_6 : f32 to vector<24x128xf32>
    %14 = arith.maximumf %12, %13 : vector<24x128xf32>
    %15 = vector.broadcast %4 : vector<24x1xf32> to vector<24x128xf32>
    %16 = arith.mulf %15, %14 : vector<24x128xf32>
    %17 = arith.addf %10, %16 : vector<24x128xf32>
    %cst_7 = arith.constant dense<0.000000e+00> : vector<128xf32>
    %18 = vector.multi_reduction <add>, %17, %cst_7 [0] : vector<24x128xf32> to vector<128xf32>
    %19 = vector.shape_cast %18 : vector<128xf32> to vector<1x128xf32>
    %c0_8 = arith.constant 0 : index
    %c0_9 = arith.constant 0 : index
    %20 = vector.load %arg3[%c0_8, %c0_9] : memref<1x128xf32, #tpu.memory_space<vmem>>, vector<1x128xf32>
    tpu.vector_store %arg3[%c0_8, %c0_9], %19 {strides = array<i32>} : memref<1x128xf32, #tpu.memory_space<vmem>>, vector<1x128xf32>,
    return
  }
  func.func @transform_0(%arg0: i32) -> (i32, i32) {
    %c0_i32 = arith.constant 0 : i32
    %c0_i32_0 = arith.constant 0 : i32
    return %c0_i32, %arg0 : i32, i32
  }
  func.func @transform_1(%arg0: i32) -> (i32, i32) {
    %c0_i32 = arith.constant 0 : i32
    %c0_i32_0 = arith.constant 0 : i32
    %c0_i32_1 = arith.constant 0 : i32
    return %c0_i32, %c0_i32_0 : i32, i32
  }
  func.func @transform_2(%arg0: i32) -> (i32, i32) {
    %c0_i32 = arith.constant 0 : i32
    %c0_i32_0 = arith.constant 0 : i32
    return %c0_i32, %arg0 : i32, i32
  }
}

</mosaic_0001>

<bundles_post_ra>
// kernel: tpu_custom_call.1
= control target key start
LH: loop header
LB: loop body
LE: loop exit
PB: predicated region body
PF: predicated region fallthrough
CT: control target
= control target key end

     0   :  { %7 = vsyncpa [#allocation3], 0  ;;  %s654_s0 = inlined_call_operand.hbm [shape: f32[24,256], index: 0, kind: input, shape index: {}]   ;;  %s655_s1 = inlined_call_operand.vmem [shape: f32[24,4], index: 1, kind: input, shape index: {}]   ;;  %s656_s2 = inlined_call_operand.hbm [shape: f32[1,256], index: 2, kind: output, shape index: {}]  }
   0x1   :  { %9 = vsyncpa [#allocation3 + $0x1], 0 }
   0x2   :  { %10 = vsyncpa [#allocation4], 0 }
   0x3   :  { %12 = vsyncpa [#allocation4 + $0x1], 0  ;;  %s520_s9 = smov 0   ;;  %s522_s10 = smov 0  }
   0x4   :  { %s524_s11 = smov 0   ;;  %s526_s12 = smov 0  }
   0x5 LB: > { %s541_s13 = sadd.s32 4294967295, %s496_s12   ;;  %s328_s14 = sadd.s32 4294967294, %s496_s12   ;;  %s496_s12 = sphi %s526_s12, %s664_s12   ;;  %s492_s11 = sphi %s524_s11, %s663_s11   ;;  %s488_s10 = sphi %s522_s10, %s662_s10   ;;  %s484_s9 = sphi %s520_s9, %s661_s9  }
   0x6   : > { %s545_s15 = sadd.s32 1, %s496_s12   ;;  %s25_s16 = sadd.s32 1, %s492_s11 }
   0x7   : > { %s22_s17 = ssub.s32 %s496_s12, %s545_s15  ;;  %p32_p0 = scmp.ne.s32.totalorder %s492_s11, %s488_s10 }
   0x8   : > { %p23_p1 = scmp.eq.s32.totalorder %s22_s17, 0  ;;  %p33_p2 = scmp.eq.s32.totalorder %s496_s12, 0 }
   0x9   : > { %p38_p3 = scmp.ne.s32.totalorder %s488_s10, %s484_s9  ;;  %p39_p4 = scmp.eq.s32.totalorder %s541_s13, 0 }
   0xa   : > { %s557_s18 = scalar_select %p23_p1, %s492_s11, %s25_s16  }
   0xb   : > { %p34_p5 = por %p33_p2, %p32_p0  ;;  %p559_p6 = por %p39_p4, %p38_p3 }
   0xc   : > { %p83_p7 = scmp.eq.s32.totalorder %s541_s13, 1  ;;  %p89_p8 = scmp.eq.s32.totalorder %s328_s14, 1 }
   0xd   : > { %p330_p9 = scmp.ge.s32.totalorder %s496_s12, 2  ;;  %p349_p10 = scmp.lt.s32.totalorder %s496_s12, 2 }
   0xe   : > { %p566_p11 = por %p83_p7, %p32_p0  ;;  %p570_p12 = por %p89_p8, %p38_p3 }
   0xf   : > { %s112_s22 = sand.u32 1, %s492_s11   ;;  %s331_s23 = sshll.u32 %s496_s12, 3 }
  0x10   : > { %s335_s24 = smul.u32 24, %s112_s22  ;;  %s120_s27 = scalar_lea.hbm %s654_s0, %s331_s23 }
  0x11   : > { %p579_p13 = pnand %p349_p10, %p34_p5  ;;  %s121_s29 = sshll.u32 %s120_s27, 4  ;;  %s122_s29 = int_to_ptr.hbm [resolvable:$true] %s121_s29 }
  0x12   : > { %s116_s30 = scalar_lea.vmem [#allocation2], %s335_s24  ;;  %p332_p0 = scmp.ge.s32.totalorder %s496_s12, 1 }
  0x13   : > { %s123_s3 = sshll.u32 %s116_s30, 4  ;;  %s113_s4 = scalar_lea.sflag [#allocation3], %s112_s22  ;;  %s124_s3 = int_to_ptr.vmem [resolvable:$true] %s123_s3 }
  0x14   : > { %s400_s5 = sshra.s32 %s122_s29, 4  ;;  %p404_p2 = pneg %p579_p13  ;;  %s401_s5 = int_to_ptr.hbm [resolvable:$true] %s400_s5 }
  0x15   : > { %s402_s6 = scalar_lea.hbm %s401_s5, 24  ;;  %s407_s14 = scalar_lea.hbm %s654_s0, 48 }
  0x16   : > { %p403_p1 = scmp.ne.s32.totalorder %s401_s5, %s402_s6  ;;  %p408_p5 = scmp.lt.s32.totalorder %s401_s5, %s654_s0 }
  0x17   : > { %p409_p7 = scmp.lt.s32.totalorder %s407_s14, %s402_s6 }
  0x18   : > { %p405_p3 = pnand %p404_p2, %p403_p1 }
  0x19   : > { %p410_p8 = por %p409_p7, %p408_p5 }
  0x1a   : > { %p406_p4 = pneg %p405_p3 }
  0x1c   : > { %p411_p10 = pnand %p410_p8, %p406_p4 }
  0x1e   : > { %414 = shalt.err (!%p411_p10)
}
  0x1f   : > { %s498_s22 = smov 256   ;;  %s499_s23 = smov 128  }
  0x20   : > { %s500_s24 = smov 8   ;;  %p131_p1 = scmp.lt.s32.totalorder %s496_s12, 3 }
  0x21   : > { %344 = dma.hbm_to_vmem [thread:$0]  (!%p579_p13), %s122_s29, 384, %s124_s3, %s113_s4, %s498_s22, %s499_s23, %s500_s24  }
  0x22   : > { %p132_p2 = pnand %p332_p0, %p131_p1 }
  0x23   : > { %s598_s25 = sand.u32 (!%p132_p2), 1, %s488_s10  }
  0x24   : > { %135 = sbr.rel (%p132_p2) target bundleno = 208 (0xd0), region = 28  ;;  %s138_s27 = scalar_lea.sflag (!%p132_p2), [#allocation3], %s598_s25 }
  0x25   : > { %s336_s26 = smul.u32 (!%p132_p2), 24, %s598_s25 }
  0x27   : > { %s602_s30 = scalar_lea.vmem (!%p132_p2), [#allocation2], %s336_s26 }
  0x29   : > { %475 = dma.done.wait (%p559_p6), %s138_s27, 384  }
  0x2a   : > { %477 = vsyncadd (%p559_p6), %s138_s27, 4294966912  ;;  %v501_v0 = vmov 0   ;;  %v502_v1 = vmov 1   ;;  %v165_v2 = vld [vmem:[%s655_s1] sm:$0xff]  ;;  %v167_v3 = vld [vmem:[%s655_s1 + $0x10] sm:$0xff]  ;;  %v503_v5 = vmov 2   ;;  %s258_s8 = scalar_lea.hbm %s656_s2, %s541_s13 }
  0x2b   : > { %391 = vset.pattern.permute.xlu1 %v501_v0  ;;  %390 = vset.pattern.permute.xlu0 %v502_v1  ;;  %v166_v4 = vld [vmem:[%s655_s1 + $0x8] sm:$0xff]  ;;  %v504_v6 = vmov 3   ;;  %v162_v14 = vld [vmem:[%s602_s30] sm:$0xff]  ;;  %s161_s14 = scalar_lea.vmem [#allocation5], %s598_s25  ;;  %s262_s17 = sshll.u32 %s258_s8, 4  ;;  %s263_s17 = int_to_ptr.hbm [resolvable:$true] %s262_s17 }
  0x2c   : > { %392 = vset.pattern.permute.xlu2 %v502_v1  ;;  %205 = vperm.xlu1 %391, %v165_v2   ;;  %v164_v15 = vld [vmem:[%s602_s30 + $0x10] sm:$0xff]  ;;  %v163_v18 = vld [vmem:[%s602_s30 + $0x8] sm:$0xff]  ;;  %s260_s16 = sshll.u32 %s161_s14, 4  ;;  %s250_s22 = scalar_lea.sflag [#allocation4], %s598_s25  ;;  %s261_s16 = int_to_ptr.vmem [resolvable:$true] %s260_s16 }
  0x2d   : > { %170 = vperm.xlu0 %390, %v165_v2   ;;  %180 = vperm.xlu2 %392, %v167_v3   ;;  %s444_s23 = sshra.s32 %s263_s17, 4  ;;  %s450_s13 = scalar_lea.hbm %s656_s2, 2  ;;  %s445_s23 = int_to_ptr.hbm [resolvable:$true] %s444_s23 }
  0x2e   : > { %s446_s24 = scalar_lea.hbm %s445_s23, 1  ;;  %p451_p3 = scmp.lt.s32.totalorder %s445_s23, %s656_s2 }
  0x2f   : > { %p447_p6 = scmp.ne.s32.totalorder %s445_s23, %s446_s24  ;;  %p452_p4 = scmp.lt.s32.totalorder %s450_s13, %s446_s24 }
  0x31   : > { %p448_p13 = pnand %p447_p6, %p566_p11  ;;  %p453_p5 = por %p452_p4, %p451_p3 }
  0x33   : > { %p449_p0 = pneg %p448_p13 }
  0x34   : > { %209 = vperm.xlu1 %391, %v166_v4  }
  0x35   : > { %175 = vperm.xlu0 %390, %v166_v4   ;;  %393 = vset.pattern.permute.xlu2 %v501_v0  ;;  %p454_p7 = pnand %p453_p5, %p449_p0 }
  0x36   : > { %213 = vperm.xlu2 %393, %v167_v3  }
  0x3c   : > { %395 = vset.pattern.permute.xlu1 %v503_v5 }
  0x3d   : > { %394 = vset.pattern.permute.xlu0 %v503_v5  ;;  %194 = vperm.xlu1 %395, %v166_v4  }
  0x3e   : > { %190 = vperm.xlu0 %394, %v165_v2   ;;  %396 = vset.pattern.permute.xlu2 %v504_v6 }
  0x3f   : > { %223 = vperm.xlu2 %396, %v165_v2  }
  0x45   : > { %397 = vset.pattern.permute.xlu1 %v504_v6 }
  0x46   : > { %399 = vset.pattern.permute.xlu0 %v504_v6  ;;  %227 = vperm.xlu1 %397, %v166_v4  }
  0x47   : > { %231 = vperm.xlu0 %399, %v167_v3   ;;  %398 = vset.pattern.permute.xlu2 %v503_v5 }
  0x48   : > { %198 = vperm.xlu2 %398, %v167_v3  }
  0x87   : > { %v181_v7 = vpop.permute.xlu2 %180 }
  0x88   : > { %v185_v21 = vsub.f32 %v164_v15, %v181_v7 }
  0x8a   : > { %v188_v27 = vmax.f32 %v185_v21, 0.0 }
  0x90   : > { %v214_v10 = vpop.permute.xlu2 %213 }
  0x91   : > { %v218_v22 = vsub.f32 %v214_v10, %v164_v15 }
  0x93   : > { %v221_v28 = vmax.f32 %v218_v22, 0.0 }
  0x99   : > { %v224_v13 = vpop.permute.xlu2 %223 }
  0x9e   : > { %v206_v8 = vpop.permute.xlu1 %205 }
  0x9f   : > { %v171_v9 = vpop.permute.xlu0 %170  ;;  %v216_v19 = vsub.f32 %v206_v8, %v162_v14 }
  0xa0   : > { %v183_v20 = vsub.f32 %v162_v14, %v171_v9 }
  0xa1   : > { %v219_v25 = vmax.f32 %v216_v19, 0.0 }
  0xa2   : > { %v186_v26 = vmax.f32 %v183_v20, 0.0  ;;  %v199_v29 = vpop.permute.xlu2 %198 }
  0xa3   : > { %v234_v35 = vmul.f32 %v224_v13, %v219_v25  ;;  %v203_v39 = vmul.f32 %v199_v29, %v188_v27 }
  0xa6   : > { %v210_v11 = vpop.permute.xlu1 %209 }
  0xa7   : > { %v176_v12 = vpop.permute.xlu0 %175  ;;  %v217_v23 = vsub.f32 %v210_v11, %v163_v18 }
  0xa8   : > { %v184_v24 = vsub.f32 %v163_v18, %v176_v12 }
  0xa9   : > { %v220_v30 = vmax.f32 %v217_v23, 0.0 }
  0xaa   : > { %v187_v31 = vmax.f32 %v184_v24, 0.0 }
  0xaf   : > { %v195_v16 = vpop.permute.xlu1 %194 }
  0xb0   : > { %v191_v17 = vpop.permute.xlu0 %190  ;;  %v202_v36 = vmul.f32 %v195_v16, %v187_v31 }
  0xb1   : > { %v201_v32 = vmul.f32 %v191_v17, %v186_v26 }
  0xb3   : > { %v237_v40 = vadd.f32 %v234_v35, %v201_v32 }
  0xb8   : > { %v228_v33 = vpop.permute.xlu1 %227 }
  0xb9   : > { %v232_v34 = vpop.permute.xlu0 %231  ;;  %v235_v37 = vmul.f32 %v228_v33, %v220_v30 }
  0xba   : > { %v236_v38 = vmul.f32 %v232_v34, %v221_v28 }
  0xbb   : > { %v238_v41 = vadd.f32 %v235_v37, %v202_v36 }
  0xbc   : > { %v239_v43 = vadd.f32 %v236_v38, %v203_v39 }
  0xbd   : > { %v240_v42 = vadd.f32 %v238_v41, %v237_v40 }
  0xbf   : > { %v241_v44 = vadd.f32 %v240_v42, %v239_v43 }
  0xc1   : > { %v242_v45 = vrot.slane %v241_v44, 4 }
  0xc3   : > { %v243_v46 = vadd.f32 %v242_v45, %v241_v44 }
  0xc5   : > { %v244_v47 = vrot.slane %v243_v46, 2 }
  0xc7   : > { %v245_v48 = vadd.f32 %v244_v47, %v243_v46 }
  0xc9   : > { %v246_v49 = vrot.slane %v245_v48, 1 }
  0xcb   : > { %v247_v50 = vadd.f32 %v246_v49, %v245_v48 }
  0xcd   : > { %248 = vst [vmem:[%s161_s14] sm:$0x1] %v247_v50 }
  0xce   : > { %457 = shalt.err (!%p454_p7)
}
  0xcf   : > { %339 = dma.vmem_to_hbm [thread:$0]  (%p566_p11), %s261_s16, 16, %s263_s17, %s250_s22  }
  0xd0 PF: > { %s274_s25 = sand.u32 1, %s484_s9   ;;  %p346_p8 = pnand %p330_p9, %p570_p12 }
  0xd1   : > { %s275_s29 = scalar_lea.sflag [#allocation4], %s274_s25 }
  0xd2   : > { %p347_p10 = pneg %p346_p8 }
  0xd4   : > { %479 = dma.done.wait (%p347_p10), %s275_s29, 16  }
  0xd5   : > { %481 = vsyncadd (%p347_p10), %s275_s29, 4294967280  ;;  %p15_p1 = scmp.ge.s32.totalorder %s545_s15, 4   ;;  %s661_s9 = smov %s488_s10 }
  0xd6   : > { %s662_s10 = smov %s492_s11  ;;  %s663_s11 = smov %s557_s18 }
  0xd7   : > { %s664_s12 = smov %s545_s15  ;;  %17 = sbr.rel (!%p15_p1) target bundleno = 5 (0x5), region = 73 }
  0xdc   :  { %280 = vsyncpa [#allocation3], 1 }
  0xdd   :  { %282 = vsyncpa [#allocation3 + $0x1], 1 }
  0xde   :  { %283 = vsyncpa [#allocation4], 1 }
  0xdf   :  { %285 = vsyncpa [#allocation4 + $0x1], 1 }

</bundles_post_ra>
